<compile_context>
chip_gen: v7x
topology: tpu7x:2x2x1
jax: 0.10.0
libtpu: 0.0.40
codegen_flags: <defaults>
</compile_context>

<pallas_src>
import jax
import jax.numpy as jnp
from jax.experimental import pallas as pl
from jax.experimental.pallas import tpu as pltpu

KS = 3
KVOL = KS * KS * KS
BN_EPS = 1e-5


def _round_up(x, m):
    return (x + m - 1) // m * m


def _vmem_limit_bytes():
    """Per-generation VMEM budget: ~48 MiB on v7x (64 MiB phys), ~96 MiB on v5e/v6e (128 MiB)."""
    cap = 128 * 1024 * 1024
    try:
        cap = int(getattr(pltpu.get_tpu_info(), "vmem_capacity_bytes", cap))
    except Exception:
        pass
    return min((cap // 4) * 3, 100 * 1024 * 1024)


def _select_tiling(n, kcin, cout_pad, vmem_limit):
    """Largest N-tile that fits VMEM (<=1024 rows), but always >= 2 grid steps so the single
    "parallel" axis shards across both v7x TensorCores."""
    per_row = 2 * kcin * 2 + 2 * cout_pad * 2          # dbl-buffered bf16 gathered in + bf16 y out
    resident = 2 * kcin * cout_pad * 2                 # weight (conservatively double-buffered)
    budget = (vmem_limit * 7) // 10 - resident
    tn = max(16, min(1024, (budget // per_row) // 16 * 16))
    tn = min(tn, _round_up(-(-n // 2), 16))            # cap at ceil(n/2): >= 2 tiles when possible
    tn = max(tn, 16)
    n_pad = _round_up(n, tn)
    return tn, n_pad


# --------------------------------------------------------------------------------------
# Pass 1: one deep-K MXU matmul per N-tile (27 offsets folded into the contraction)
#         + per-tile BatchNorm partial sums (f32).  y stored as bf16.
# --------------------------------------------------------------------------------------
def _deconv_matmul_kernel(g_ref, w_ref, y_ref, sum_ref, ssq_ref):
    y = jnp.dot(g_ref[...], w_ref[...], preferred_element_type=jnp.float32)
    y_ref[...] = y.astype(y_ref.dtype)                       # bf16 store (halved HBM traffic)
    sum_ref[0, :, :] = jnp.sum(y, axis=0, keepdims=True)     # (1, Cout_pad) f32
    ssq_ref[0, :, :] = jnp.sum(y * y, axis=0, keepdims=True)


# --------------------------------------------------------------------------------------
# Pass 2: global BatchNorm affine (precomputed scale/bias) + ReLU, lane-dense f32 output.
# --------------------------------------------------------------------------------------
def _bn_relu_kernel(y_ref, scale_ref, bias_ref, o_ref):
    y = y_ref[...].astype(jnp.float32)                       # upcast bf16 -> f32 (v5e-safe)
    z = y * scale_ref[...] + bias_ref[...]
    o_ref[...] = jnp.maximum(z, 0.0).astype(o_ref.dtype)


# --------------------------------------------------------------------------------------
# Kernel-map construction (sort + searchsorted; coordinates are unique).
# --------------------------------------------------------------------------------------
def _kernel_offsets():
    r = jnp.arange(-(KS // 2), KS // 2 + 1, dtype=jnp.int32)
    ox, oy, oz = jnp.meshgrid(r, r, r, indexing="ij")
    off = jnp.stack([ox, oy, oz], axis=-1).reshape(-1, 3)                      # (27, 3)
    return jnp.concatenate([jnp.zeros((KVOL, 1), jnp.int32), off], axis=1)     # (27, 4)


def build_kernel_map(coords, n):
    """(N, 27) int32: for output j and kernel offset k, input index i with
    coords[i] == coords[j] - d_k, or n ("missing").  Reuse/cache across layers sharing the
    same coordinate set (torchsparse caches kmaps)."""
    c = coords.astype(jnp.int32)
    mins = jnp.min(c, axis=0)
    # 1-voxel spatial halo so shifted queries never alias another voxel's key.
    shift = mins - jnp.array([0, 1, 1, 1], jnp.int32)
    dims = jnp.max(c, axis=0) - shift + jnp.array([1, 2, 2, 2], jnp.int32)

    # TODO(synk): int32 linearized keys overflow for very large grids; switch to a 64-bit /
    # hashed key (torchsparse uses a GPU hash table) for production-scale scenes.
    def encode(q):
        qs = q - shift
        return ((qs[..., 0] * dims[1] + qs[..., 1]) * dims[2] + qs[..., 2]) * dims[3] + qs[..., 3]

    keys = encode(c)                                    # (N,)
    order = jnp.argsort(keys)
    keys_sorted = keys[order]

    offsets = _kernel_offsets()                         # (27, 4)
    # transposed conv (mirrored pairing): input for output j at kernel k sits at coords[j]-d_k
    query = c[None, :, :] - offsets[:, None, :]         # (27, N, 4)
    qkeys = encode(query)                               # (27, N)
    pos = jnp.searchsorted(keys_sorted, qkeys, method="sort")
    pos_c = jnp.clip(pos, 0, n - 1)
    found = keys_sorted[pos_c] == qkeys
    nbr = jnp.where(found, order[pos_c], n)             # n = "missing"
    return nbr.T.astype(jnp.int32)                      # (N, 27)


# --------------------------------------------------------------------------------------
# Wrapper
# --------------------------------------------------------------------------------------
def basic_deconvolution_block(feats, coords, weight, gamma, beta, nbr=None):
    """feats [N, Cin] f32, coords [N, 4] i32 (unique), weight [27, Cin, Cout],
    gamma/beta [Cout].  Returns [N, Cout] f32.  Pass a precomputed `nbr` to reuse a
    cached kernel map across layers sharing the coordinate set."""
    n, cin = feats.shape
    cout = weight.shape[-1]
    kcin = KVOL * cin
    cout_pad = _round_up(cout, 128)     # lane-dense stores; no wider (kernel is HBM-bound)

    vmem_limit = _vmem_limit_bytes()
    tn, n_pad = _select_tiling(n, kcin, cout_pad, vmem_limit)
    num_tiles = n_pad // tn

    # ---- glue: kernel map + im2col gather into the folded (N_pad, 27*Cin) bf16 layout ----
    # TODO(synk): moving this gather inside pass 1 (nbr in SMEM + VMEM-resident feats) would
    # remove the 27x-expanded HBM write+read; no robust Mosaic row-gather primitive today.
    if nbr is None:
        nbr = build_kernel_map(coords, n)
    if n_pad > n:
        nbr = jnp.concatenate([nbr, jnp.full((n_pad - n, KVOL), n, jnp.int32)], axis=0)
    feats_bf = jnp.concatenate(
        [feats.astype(jnp.bfloat16), jnp.zeros((1, cin), jnp.bfloat16)], axis=0)   # (N+1, Cin)
    gathered = jnp.take(feats_bf, nbr, axis=0).reshape(n_pad, kcin)                # bf16

    # TODO(synk): torchsparse transposed-conv convention assumed to pair W[k] with input at
    # coords[j] - d_k; a mirrored convention would require W[26 - k] (verify vs. checkpoint).
    w2 = weight.reshape(kcin, cout).astype(jnp.bfloat16)
    w2 = jnp.pad(w2, ((0, 0), (0, cout_pad - cout)))                               # (kcin, Cout_pad)
    gamma_p = jnp.pad(gamma.astype(jnp.float32), (0, cout_pad - cout))
    beta_p = jnp.pad(beta.astype(jnp.float32), (0, cout_pad - cout))

    cparams = pltpu.CompilerParams(
        dimension_semantics=("parallel",),
        vmem_limit_bytes=vmem_limit,
    )
    cost1 = pl.CostEstimate(
        flops=2 * n_pad * kcin * cout_pad,
        transcendentals=0,
        bytes_accessed=(n_pad * kcin * 2 + kcin * cout_pad * 2
                        + n_pad * cout_pad * 2 + 2 * num_tiles * cout_pad * 4),
    )

    # ---- pass 1: one deep-K MXU matmul per N tile + BN partial sums ----
    y, tsum, tssq = pl.pallas_call(
        _deconv_matmul_kernel,
        out_shape=(
            jax.ShapeDtypeStruct((n_pad, cout_pad), jnp.bfloat16),         # bf16 intermediate
            jax.ShapeDtypeStruct((num_tiles, 1, cout_pad), jnp.float32),   # per-tile sum
            jax.ShapeDtypeStruct((num_tiles, 1, cout_pad), jnp.float32),   # per-tile sum of squares
        ),
        grid_spec=pltpu.PrefetchScalarGridSpec(
            num_scalar_prefetch=0,
            grid=(num_tiles,),
            in_specs=[
                pl.BlockSpec((tn, kcin), lambda i: (i, 0)),        # gathered feats tile (bf16)
                # constant index_map -> weight DMA'd once, VMEM-resident across tiles.
                # TODO(synk): pipeline_mode=pl.Buffered(1) would halve its footprint on v7x.
                pl.BlockSpec((kcin, cout_pad), lambda i: (0, 0)),
            ],
            out_specs=[
                pl.BlockSpec((tn, cout_pad), lambda i: (i, 0)),
                pl.BlockSpec((1, 1, cout_pad), lambda i: (i, 0, 0)),
                pl.BlockSpec((1, 1, cout_pad), lambda i: (i, 0, 0)),
            ],
        ),
        compiler_params=cparams,
        cost_estimate=cost1,
    )(gathered, w2)

    # ---- tiny global reduction for BatchNorm (training-mode batch stats, f32) ----
    tot_s = jnp.sum(tsum, axis=(0, 1))                  # padded rows contribute 0
    tot_q = jnp.sum(tssq, axis=(0, 1))
    mean = tot_s / n
    # TODO(synk): E[x^2]-E[x]^2 can cancel when |mean| >> std; running_mean/var (eval-mode
    # module state) are not tracked.
    var = jnp.maximum(tot_q / n - mean * mean, 0.0)
    scale = gamma_p * jax.lax.rsqrt(var + BN_EPS)
    bias = beta_p - mean * scale

    # ---- pass 2: affine + ReLU, lane-dense f32 output ----
    # TODO(synk): if this block feeds another Pallas layer, fold scale/bias+ReLU into that
    # layer's load path and delete this pass; in/out dtypes differ (bf16 -> f32) so
    # input_output_aliases cannot be used here.
    out = pl.pallas_call(
        _bn_relu_kernel,
        out_shape=jax.ShapeDtypeStruct((n_pad, cout_pad), jnp.float32),
        grid_spec=pltpu.PrefetchScalarGridSpec(
            num_scalar_prefetch=0,
            grid=(num_tiles,),
            in_specs=[
                pl.BlockSpec((tn, cout_pad), lambda i: (i, 0)),
                pl.BlockSpec((1, cout_pad), lambda i: (0, 0)),
                pl.BlockSpec((1, cout_pad), lambda i: (0, 0)),
            ],
            out_specs=pl.BlockSpec((tn, cout_pad), lambda i: (i, 0)),
        ),
        compiler_params=cparams,
        cost_estimate=pl.CostEstimate(
            flops=2 * n_pad * cout_pad, transcendentals=0,
            bytes_accessed=n_pad * cout_pad * (2 + 4) + 2 * cout_pad * 4),
    )(y, scale.reshape(1, cout_pad), bias.reshape(1, cout_pad))

    return out[:n, :cout]


if __name__ == "__main__":
    # Small deterministic example: N=128 sparse voxels, Cin=16, Cout=32, batch=2, 8^3 grid.
    N, CIN, COUT = 128, 16, 32
    B, S = 2, 8

    key = jax.random.PRNGKey(0)
    k_perm, k_feat, k_w, k_g, k_b = jax.random.split(key, 5)

    # Unique voxel coordinates (b, x, y, z)
    bb, xx, yy, zz = jnp.meshgrid(
        jnp.arange(B), jnp.arange(S), jnp.arange(S), jnp.arange(S), indexing="ij")
    all_coords = jnp.stack([bb, xx, yy, zz], axis=-1).reshape(-1, 4).astype(jnp.int32)
    perm = jax.random.permutation(k_perm, all_coords.shape[0])
    coords = all_coords[perm[:N]]                                   # (N, 4), unique

    feats = jax.random.normal(k_feat, (N, CIN), dtype=jnp.float32)

    fan = CIN * KVOL
    weight = jax.random.normal(k_w, (KVOL, CIN, COUT), dtype=jnp.float32) * (1.0 / fan ** 0.5)
    gamma = 1.0 + 0.1 * jax.random.normal(k_g, (COUT,), dtype=jnp.float32)
    beta = 0.1 * jax.random.normal(k_b, (COUT,), dtype=jnp.float32)

    fwd = jax.jit(basic_deconvolution_block)
    out = fwd(feats, coords, weight, gamma, beta)
    jax.block_until_ready(out)

    assert out.shape == (N, COUT) and out.dtype == jnp.float32
    assert bool(jnp.all(jnp.isfinite(out)))
    assert bool(jnp.all(out >= 0.0))  # ReLU

    # Loose numeric check vs. a pure-JAX f32 reference (same conv pairing / kernel map).
    nbr_ref = build_kernel_map(coords, N)
    featsz = jnp.concatenate([feats, jnp.zeros((1, CIN), jnp.float32)], axis=0)
    g_ref = jnp.take(featsz, nbr_ref, axis=0)                       # (N, 27, Cin)
    y_ref = jnp.einsum("nkc,kco->no", g_ref, weight)
    mean_ref = y_ref.mean(axis=0)
    var_ref = y_ref.var(axis=0)
    ref = jnp.maximum((y_ref - mean_ref) * jax.lax.rsqrt(var_ref + BN_EPS) * gamma + beta, 0.0)
    max_err = float(jnp.max(jnp.abs(out - ref)))
    assert max_err < 0.2, f"max_err={max_err}"

    print("KERNEL_OK")
</pallas_src>

<mosaic_0001>
module attributes {stable_mosaic.version = 11 : i64} {
  func.func @_bn_relu_kernel(%arg0: i32, %arg1: memref<64x128xbf16, #tpu.memory_space<vmem>>, %arg2: memref<1x128xf32, #tpu.memory_space<vmem>>, %arg3: memref<1x128xf32, #tpu.memory_space<vmem>>, %arg4: memref<64x128xf32, #tpu.memory_space<vmem>>) attributes {dimension_semantics = [#tpu.dimension_semantics<parallel>], iteration_bounds = array<i64: 2>, scalar_prefetch = 0 : i64, scratch_operands = 0 : i64, tpu.core_type = #tpu.core_type<tc>, window_params = [{transform_indices = @transform_0, window_bounds = array<i64: 64, 128>}, {pipeline_mode = #tpu.pipeline_mode<synchronous>, transform_indices = @transform_1, window_bounds = array<i64: 1, 128>}, {pipeline_mode = #tpu.pipeline_mode<synchronous>, transform_indices = @transform_2, window_bounds = array<i64: 1, 128>}, {transform_indices = @transform_3, window_bounds = array<i64: 64, 128>}]} {
    %c0 = arith.constant 0 : index
    %c0_0 = arith.constant 0 : index
    %0 = vector.load %arg1[%c0, %c0_0] : memref<64x128xbf16, #tpu.memory_space<vmem>>, vector<64x128xbf16>
    %1 = arith.extf %0 : vector<64x128xbf16> to vector<64x128xf32>
    %c0_1 = arith.constant 0 : index
    %c0_2 = arith.constant 0 : index
    %2 = vector.load %arg2[%c0_1, %c0_2] : memref<1x128xf32, #tpu.memory_space<vmem>>, vector<1x128xf32>
    %3 = vector.broadcast %2 : vector<1x128xf32> to vector<64x128xf32>
    %4 = arith.mulf %1, %3 : vector<64x128xf32>
    %c0_3 = arith.constant 0 : index
    %c0_4 = arith.constant 0 : index
    %5 = vector.load %arg3[%c0_3, %c0_4] : memref<1x128xf32, #tpu.memory_space<vmem>>, vector<1x128xf32>
    %6 = vector.broadcast %5 : vector<1x128xf32> to vector<64x128xf32>
    %7 = arith.addf %4, %6 : vector<64x128xf32>
    %cst = arith.constant 0.000000e+00 : f32
    %8 = vector.broadcast %cst : f32 to vector<64x128xf32>
    %9 = arith.maximumf %7, %8 : vector<64x128xf32>
    %c0_5 = arith.constant 0 : index
    %c0_6 = arith.constant 0 : index
    %10 = vector.load %arg4[%c0_5, %c0_6] : memref<64x128xf32, #tpu.memory_space<vmem>>, vector<64x128xf32>
    tpu.vector_store %arg4[%c0_5, %c0_6], %9 {strides = array<i32>} : memref<64x128xf32, #tpu.memory_space<vmem>>, vector<64x128xf32>,
    return
  }
  func.func @transform_0(%arg0: i32) -> (i32, i32) {
    %c0_i32 = arith.constant 0 : i32
    %c0_i32_0 = arith.constant 0 : i32
    return %arg0, %c0_i32 : i32, i32
  }
  func.func @transform_1(%arg0: i32) -> (i32, i32) {
    %c0_i32 = arith.constant 0 : i32
    %c0_i32_0 = arith.constant 0 : i32
    %c0_i32_1 = arith.constant 0 : i32
    return %c0_i32, %c0_i32_0 : i32, i32
  }
  func.func @transform_2(%arg0: i32) -> (i32, i32) {
    %c0_i32 = arith.constant 0 : i32
    %c0_i32_0 = arith.constant 0 : i32
    %c0_i32_1 = arith.constant 0 : i32
    return %c0_i32, %c0_i32_0 : i32, i32
  }
  func.func @transform_3(%arg0: i32) -> (i32, i32) {
    %c0_i32 = arith.constant 0 : i32
    %c0_i32_0 = arith.constant 0 : i32
    return %arg0, %c0_i32 : i32, i32
  }
}

module attributes {stable_mosaic.version = 11 : i64} {
  func.func @_deconv_matmul_kernel(%arg0: i32, %arg1: memref<64x432xbf16, #tpu.memory_space<vmem>>, %arg2: memref<432x128xbf16, #tpu.memory_space<vmem>>, %arg3: memref<64x128xbf16, #tpu.memory_space<vmem>>, %arg4: memref<1x1x128xf32, #tpu.memory_space<vmem>>, %arg5: memref<1x1x128xf32, #tpu.memory_space<vmem>>) attributes {dimension_semantics = [#tpu.dimension_semantics<parallel>], iteration_bounds = array<i64: 2>, scalar_prefetch = 0 : i64, scratch_operands = 0 : i64, tpu.core_type = #tpu.core_type<tc>, window_params = [{transform_indices = @transform_0, window_bounds = array<i64: 64, 432>}, {pipeline_mode = #tpu.pipeline_mode<synchronous>, transform_indices = @transform_1, window_bounds = array<i64: 432, 128>}, {transform_indices = @transform_2, window_bounds = array<i64: 64, 128>}, {transform_indices = @transform_3, window_bounds = array<i64: 1, 1, 128>}, {transform_indices = @transform_4, window_bounds = array<i64: 1, 1, 128>}]} {
    %c0 = arith.constant 0 : index
    %c0_0 = arith.constant 0 : index
    %0 = vector.load %arg1[%c0, %c0_0] : memref<64x432xbf16, #tpu.memory_space<vmem>>, vector<64x432xbf16>
    %c0_1 = arith.constant 0 : index
    %c0_2 = arith.constant 0 : index
    %1 = vector.load %arg2[%c0_1, %c0_2] : memref<432x128xbf16, #tpu.memory_space<vmem>>, vector<432x128xbf16>
    %cst = arith.constant dense<0.000000e+00> : vector<64x128xf32>
    %2 = tpu.matmul %0, %1, %cst {dimension_numbers = #tpu.dot_dimension_numbers<[1], [0], [0], [1], [0, 0, 1, 1], [], []>} : vector<64x432xbf16>, vector<432x128xbf16>, vector<64x128xf32> -> vector<64x128xf32>
    %3 = arith.truncf %2 : vector<64x128xf32> to vector<64x128xbf16>
    %c0_3 = arith.constant 0 : index
    %c0_4 = arith.constant 0 : index
    %4 = vector.load %arg3[%c0_3, %c0_4] : memref<64x128xbf16, #tpu.memory_space<vmem>>, vector<64x128xbf16>
    tpu.vector_store %arg3[%c0_3, %c0_4], %3 {strides = array<i32>} : memref<64x128xbf16, #tpu.memory_space<vmem>>, vector<64x128xbf16>,
    %cst_5 = arith.constant dense<0.000000e+00> : vector<128xf32>
    %5 = vector.multi_reduction <add>, %2, %cst_5 [0] : vector<64x128xf32> to vector<128xf32>
    %6 = vector.shape_cast %5 : vector<128xf32> to vector<1x128xf32>
    %c0_6 = arith.constant 0 : index
    %c0_7 = arith.constant 0 : index
    %c0_8 = arith.constant 0 : index
    %7 = vector.load %arg4[%c0_6, %c0_7, %c0_8] : memref<1x1x128xf32, #tpu.memory_space<vmem>>, vector<1x1x128xf32>
    %8 = vector.shape_cast %7 : vector<1x1x128xf32> to vector<1x128xf32>
    %9 = vector.shape_cast %6 : vector<1x128xf32> to vector<1x1x128xf32>
    tpu.vector_store %arg4[%c0_6, %c0_7, %c0_8], %9 {strides = array<i32>} : memref<1x1x128xf32, #tpu.memory_space<vmem>>, vector<1x1x128xf32>,
    %10 = arith.mulf %2, %2 : vector<64x128xf32>
    %cst_9 = arith.constant dense<0.000000e+00> : vector<128xf32>
    %11 = vector.multi_reduction <add>, %10, %cst_9 [0] : vector<64x128xf32> to vector<128xf32>
    %12 = vector.shape_cast %11 : vector<128xf32> to vector<1x128xf32>
    %c0_10 = arith.constant 0 : index
    %c0_11 = arith.constant 0 : index
    %c0_12 = arith.constant 0 : index
    %13 = vector.load %arg5[%c0_10, %c0_11, %c0_12] : memref<1x1x128xf32, #tpu.memory_space<vmem>>, vector<1x1x128xf32>
    %14 = vector.shape_cast %13 : vector<1x1x128xf32> to vector<1x128xf32>
    %15 = vector.shape_cast %12 : vector<1x128xf32> to vector<1x1x128xf32>
    tpu.vector_store %arg5[%c0_10, %c0_11, %c0_12], %15 {strides = array<i32>} : memref<1x1x128xf32, #tpu.memory_space<vmem>>, vector<1x1x128xf32>,
    return
  }
  func.func @transform_0(%arg0: i32) -> (i32, i32) {
    %c0_i32 = arith.constant 0 : i32
    %c0_i32_0 = arith.constant 0 : i32
    return %arg0, %c0_i32 : i32, i32
  }
  func.func @transform_1(%arg0: i32) -> (i32, i32) {
    %c0_i32 = arith.constant 0 : i32
    %c0_i32_0 = arith.constant 0 : i32
    %c0_i32_1 = arith.constant 0 : i32
    return %c0_i32, %c0_i32_0 : i32, i32
  }
  func.func @transform_2(%arg0: i32) -> (i32, i32) {
    %c0_i32 = arith.constant 0 : i32
    %c0_i32_0 = arith.constant 0 : i32
    return %arg0, %c0_i32 : i32, i32
  }
  func.func @transform_3(%arg0: i32) -> (i32, i32, i32) {
    %c0_i32 = arith.constant 0 : i32
    %c0_i32_0 = arith.constant 0 : i32
    %c0_i32_1 = arith.constant 0 : i32
    return %arg0, %c0_i32, %c0_i32_0 : i32, i32, i32
  }
  func.func @transform_4(%arg0: i32) -> (i32, i32, i32) {
    %c0_i32 = arith.constant 0 : i32
    %c0_i32_0 = arith.constant 0 : i32
    %c0_i32_1 = arith.constant 0 : i32
    return %arg0, %c0_i32, %c0_i32_0 : i32, i32, i32
  }
}

</mosaic_0001>

<bundles_post_ra>
// kernel: basic_deconvolution_block.3
= control target key start
LH: loop header
LB: loop body
LE: loop exit
PB: predicated region body
PF: predicated region fallthrough
CT: control target
= control target key end

     0   :  { %8 = vsyncpa [#allocation3], 0  ;;  %s915_s0 = inlined_call_operand.hbm [shape: bf16[128,128], index: 0, kind: input, shape index: {}]   ;;  %s916_s1 = inlined_call_operand.hbm [shape: f32[1,128], index: 1, kind: input, shape index: {}]   ;;  %s917_s2 = inlined_call_operand.hbm [shape: f32[1,128], index: 2, kind: input, shape index: {}]   ;;  %s918_s3 = inlined_call_operand.hbm [shape: f32[128,128], index: 3, kind: output, shape index: {}]  }
   0x1   :  { %10 = vsyncpa [#allocation3 + $0x1], 0 }
   0x2   :  { %11 = vsyncpa [#allocation6], 0 }
   0x3   :  { %12 = vsyncpa [#allocation4], 0 }
   0x4   :  { %14 = vsyncpa [#allocation4 + $0x1], 0  ;;  %s682_s12 = smov 0   ;;  %s684_s13 = smov 0  }
   0x5   :  { %s686_s14 = smov 0   ;;  %s688_s15 = smov 0  }
   0x6 LB: > { %s703_s16 = sadd.s32 4294967295, %s652_s15   ;;  %s384_s17 = sadd.s32 4294967294, %s652_s15   ;;  %s652_s15 = sphi %s688_s15, %s943_s15   ;;  %s648_s14 = sphi %s686_s14, %s942_s14   ;;  %s644_s13 = sphi %s684_s13, %s941_s13   ;;  %s640_s12 = sphi %s682_s12, %s940_s12  }
   0x7   : > { %s707_s18 = sadd.s32 1, %s652_s15   ;;  %s27_s19 = sadd.s32 1, %s648_s14 }
   0x8   : > { %s24_s20 = ssub.s32 %s652_s15, %s707_s18  ;;  %p34_p0 = scmp.ne.s32.totalorder %s648_s14, %s644_s13 }
   0x9   : > { %p25_p1 = scmp.eq.s32.totalorder %s24_s20, 0  ;;  %p35_p2 = scmp.eq.s32.totalorder %s652_s15, 0 }
   0xa   : > { %p40_p3 = scmp.ne.s32.totalorder %s644_s13, %s640_s12  ;;  %p919_p4 = scmp.eq.s32.totalorder %s703_s16, 0 }
   0xb   : > { %s719_s21 = scalar_select %p25_p1, %s648_s14, %s27_s19  }
   0xc   : > { %p721_p5 = por %p35_p2, %p34_p0  ;;  %p727_p6 = por %p919_p4, %p40_p3 }
   0xd   : > { %p106_p7 = scmp.eq.s32.totalorder %s703_s16, 1  ;;  %p112_p8 = scmp.eq.s32.totalorder %s384_s17, 1 }
   0xe   : > { %s925_s23 = scalar_select %p727_p6, 1, 0 }
   0xf   : > { %p385_p9 = scmp.ge.s32.totalorder %s652_s15, 1  ;;  %p119_p10 = scmp.lt.s32.totalorder %s652_s15, 3 }
  0x10   : > { %p734_p11 = por %p106_p7, %p34_p0  ;;  %p738_p12 = por %p112_p8, %p40_p3 }
  0x11   : > { %p742_p13 = pnand %p385_p9, %p119_p10  ;;  %s654_s27 = smov [#allocation5]  }
  0x12   : > { %s926_s24 = scalar_select %p734_p11, 1, 0 }
  0x13   : > { %s927_s25 = scalar_select %p738_p12, 1, 0 }
  0x14   : > { %s928_s26 = scalar_select %p742_p13, 1, 0 }
  0x15   : > { %p437_p2 = pneg %p742_p13  ;;  %s132_s28 = sshll.u32 %s654_s27, 4  ;;  %s133_s28 = int_to_ptr.vmem [resolvable:$true] %s132_s28 }
  0x16   : > { %p454_p4 = scmp.lt.s32.totalorder %s652_s15, 2  ;;  %p929_p0 = scmp.eq.s32.totalorder %s703_s16, 0 }
  0x17   : > { %s655_s4 = smov [#allocation7]   ;;  %s496_s8 = scalar_lea.hbm %s916_s1, 16 }
  0x18   : > { %p752_p7 = pnand %p437_p2, %p929_p0  ;;  %p758_p3 = pnand %p454_p4, %p721_p5 }
  0x19   : > { %s143_s5 = sshll.u32 %s655_s4, 4  ;;  %p497_p8 = scmp.ne.s32.totalorder %s916_s1, %s496_s8  ;;  %s762_s5 = int_to_ptr.vmem [resolvable:$true] %s143_s5 }
  0x1a   : > { %s931_s30 = scalar_select %p758_p3, 1, 0 }
  0x1b   : > { %p498_p9 = pneg %p752_p7  ;;  %p503_p10 = scmp.lt.u32.totalorder %s496_s8, %s916_s1 }
  0x1d   : > { %p499_p4 = pnand %p498_p9, %p497_p8 }
  0x1f   : > { %p500_p5 = pneg %p499_p4 }
  0x21   : > { %p505_p2 = pnand %p503_p10, %p500_p5 }
  0x23   : > { %508 = shalt.err (!%p505_p2)
}
  0x24   : > { %s509_s19 = scalar_lea.vmem %s133_s28, 16  ;;  %s516_s20 = scalar_lea.vmem %s133_s28, 32 }
  0x25   : > { %p510_p0 = scmp.ne.s32.totalorder %s133_s28, %s509_s19  ;;  %p517_p11 = scmp.lt.s32.totalorder %s133_s28, %s133_s28 }
  0x26   : > { %p518_p6 = scmp.lt.s32.totalorder %s516_s20, %s509_s19 }
  0x27   : > { %p512_p1 = pnand %p510_p0, %p498_p9 }
  0x28   : > { %p519_p13 = por %p518_p6, %p517_p11 }
  0x29   : > { %p513_p12 = pneg %p512_p1 }
  0x2b   : > { %p520_p3 = pnand %p519_p13, %p513_p12 }
  0x2d   : > { %523 = shalt.err (!%p520_p3)
}
  0x2e   : > { %440 = dma.hbm_to_vmem [thread:$0]  (!%p752_p7), %s916_s1, 16, %s133_s28, [#allocation6]  }
  0x2f   : > { %s154_s4 = sand.u32 1, %s648_s14   ;;  %s524_s8 = scalar_lea.hbm %s917_s2, 16 }
  0x30   : > { %p525_p1 = scmp.ne.s32.totalorder %s917_s2, %s524_s8  ;;  %p531_p12 = scmp.lt.u32.totalorder %s524_s8, %s917_s2 }
  0x32   : > { %p527_p6 = pnand %p525_p1, %p498_p9 }
  0x34   : > { %p528_p11 = pneg %p527_p6 }
  0x36   : > { %p533_p13 = pnand %p531_p12, %p528_p11 }
  0x38   : > { %536 = shalt.err (!%p533_p13)
}
  0x39   : > { %s537_s28 = scalar_lea.vmem %s762_s5, 16  ;;  %s544_s19 = scalar_lea.vmem %s762_s5, 32 }
  0x3a   : > { %p538_p3 = scmp.ne.s32.totalorder %s762_s5, %s537_s28  ;;  %p545_p5 = scmp.lt.s32.totalorder %s762_s5, %s762_s5 }
  0x3b   : > { %p546_p10 = scmp.lt.s32.totalorder %s544_s19, %s537_s28 }
  0x3c   : > { %p540_p8 = pnand %p538_p3, %p498_p9 }
  0x3d   : > { %p547_p2 = por %p546_p10, %p545_p5 }
  0x3e   : > { %p541_p4 = pneg %p540_p8 }
  0x40   : > { %p548_p0 = pnand %p547_p2, %p541_p4 }
  0x42   : > { %551 = shalt.err (!%p548_p0)
}
  0x43   : > { %443 = dma.hbm_to_vmem [thread:$0]  (!%p752_p7), %s917_s2, 16, %s762_s5, [#allocation6]  }
  0x44   : > { %s389_s27 = sshll.u32 %s154_s4, 5  ;;  %s404_s6 = sshll.u32 %s652_s15, 9 }
  0x45   : > { %s817_s9 = scalar_lea.hbm %s915_s0, %s404_s6  ;;  %s158_s29 = scalar_lea.vmem [#allocation2], %s389_s27 }
  0x46   : > { %s165_s10 = sshll.u32 %s158_s29, 4  ;;  %s821_s11 = scalar_lea.sflag [#allocation3], %s154_s4  ;;  %s819_s10 = int_to_ptr.vmem [resolvable:$true] %s165_s10 }
  0x47   : > { %s552_s17 = scalar_lea.hbm %s817_s9, 512  ;;  %p932_p7 = scmp.ne.s32.totalorder %s931_s30, 0 }
  0x48   : > { %p553_p9 = scmp.ne.s32.totalorder %s817_s9, %s552_s17  ;;  %s557_s19 = scalar_lea.hbm %s915_s0, 1024 }
  0x49   : > { %p554_p1 = pneg %p932_p7  ;;  %p558_p12 = scmp.lt.u32.totalorder %s817_s9, %s915_s0 }
  0x4a   : > { %p559_p13 = scmp.lt.u32.totalorder %s557_s19, %s552_s17  ;;  %p561_p8 = scmp.lt.u32.totalorder %s552_s17, %s817_s9 }
  0x4b   : > { %p555_p6 = pnand %p554_p1, %p553_p9 }
  0x4c   : > { %p560_p3 = por %p559_p13, %p558_p12 }
  0x4d   : > { %p556_p11 = pneg %p555_p6 }
  0x4e   : > { %p562_p4 = por %p561_p8, %p560_p3 }
  0x50   : > { %p563_p5 = pnand %p562_p4, %p556_p11 }
  0x52   : > { %566 = shalt.err (!%p563_p5)
}
  0x53   : > { %s567_s4 = scalar_lea.vmem %s819_s10, 512  ;;  %s656_s27 = smov [#allocation2]  }
  0x54   : > { %p568_p10 = scmp.ne.s32.totalorder %s819_s10, %s567_s4  ;;  %s572_s6 = sshll.u32 %s656_s27, 4  ;;  %s573_s6 = int_to_ptr.vmem [resolvable:$false] %s572_s6 }
  0x55   : > { %s574_s7 = scalar_lea.vmem %s573_s6, 1024  ;;  %p575_p9 = scmp.lt.s32.totalorder %s819_s10, %s573_s6 }
  0x56   : > { %p570_p2 = pnand %p568_p10, %p554_p1  ;;  %p576_p6 = scmp.lt.s32.totalorder %s574_s7, %s567_s4 }
  0x58   : > { %p571_p0 = pneg %p570_p2  ;;  %p577_p12 = por %p576_p6, %p575_p9 }
  0x5a   : > { %p578_p13 = pnand %p577_p12, %p571_p0 }
  0x5c   : > { %581 = shalt.err (!%p578_p13)
}
  0x5d   : > { %s657_s8 = smov 64   ;;  %s658_s29 = smov 4  }
  0x5e   : > { %447 = dma.hbm_to_vmem [thread:$0]  (!%p932_p7), %s817_s9, 512, %s819_s10, %s821_s11, %s657_s8, %s657_s8, %s658_s29  }
  0x5f   : > { %p933_p1 = scmp.ne.s32.totalorder %s928_s26, 0 }
  0x60   : > { %s852_s17 = sand.u32 (!%p933_p1), 1, %s644_s13   ;;  %p934_p11 = scmp.ne.s32.totalorder (!%p933_p1), %s925_s23, 0 }
  0x61   : > { %177 = sbr.rel (%p933_p1) target bundleno = 135 (0x87), region = 32  ;;  %s393_s5 = sshll.u32 (!%p933_p1), %s852_s17, 5 }
  0x62   : > { %s180_s28 = scalar_lea.sflag (!%p933_p1), [#allocation3], %s852_s17  ;;  %s183_s19 = scalar_lea.vmem (!%p933_p1), [#allocation2], %s393_s5 }
  0x68   : > { %627 = dma.done.wait (%p934_p11), %s180_s28, 512  }
  0x69   : > { %629 = vsyncadd (%p934_p11), %s180_s28, 4294966784  ;;  %p935_p3 = scmp.eq.s32.totalorder %s703_s16, 0 }
  0x6b   : > { %631 = dma.done.wait (%p935_p3), [#allocation6], 32   ;;  %p936_p7 = pmov %p935_p3 }
  0x6c   : > { %s396_s26 = sshll.u32 %s852_s17, 6  ;;  %v407_v0 = vld [vmem:[%s183_s19] sm:$0xff]   ;;  %v422_v4 = vld [vmem:[%s183_s19 + $0x8] sm:$0xff]   ;;  %v423_v5 = vld [vmem:[%s183_s19 + $0x10] sm:$0xff]   ;;  %s405_s9 = sshll.u32 %s703_s16, 10 }
  0x6d   : > { %633 = vsyncadd (%p936_p7), [#allocation6], 4294967264  ;;  %v397_v1 = vld [vmem:[#allocation5] ss:$0 sm:$0xff]  ;;  %v408_v2 = vunpack.c.l.bf16 %v407_v0  ;;  %v409_v3 = vunpack.c.h.bf16 %v407_v0  ;;  %v424_v6 = vld [vmem:[%s183_s19 + $0x18] sm:$0xff]   ;;  %v412_v8 = vunpack.c.l.bf16 %v422_v4  ;;  %v413_v9 = vunpack.c.h.bf16 %v422_v4  ;;  %s213_s23 = scalar_lea.vmem [#allocation8], %s396_s26  ;;  %s871_s11 = scalar_lea.hbm %s918_s3, %s405_s9 }
  0x6e   : > { %v398_v7 = vld [vmem:[#allocation7] ss:$0 sm:$0xff]  ;;  %v416_v10 = vunpack.c.l.bf16 %v423_v5  ;;  %v417_v11 = vunpack.c.h.bf16 %v423_v5  ;;  %v420_v14 = vunpack.c.l.bf16 %v424_v6  ;;  %v421_v15 = vunpack.c.h.bf16 %v424_v6  ;;  %s292_s30 = sshll.u32 %s213_s23, 4  ;;  %s279_s20 = scalar_lea.sflag [#allocation4], %s852_s17  ;;  %s866_s30 = int_to_ptr.vmem [resolvable:$true] %s292_s30 }
  0x6f   : > { %v239_v12 = vmul.f32 %v408_v2, %v397_v1  ;;  %v240_v13 = vmul.f32 %v409_v3, %v397_v1  ;;  %v241_v16 = vmul.f32 %v412_v8, %v397_v1  ;;  %v242_v17 = vmul.f32 %v413_v9, %v397_v1  ;;  %s582_s22 = scalar_lea.vmem %s866_s30, 1024  ;;  %p937_p4 = scmp.ne.s32.totalorder %s926_s24, 0 }
  0x70   : > { %v243_v18 = vmul.f32 %v416_v10, %v397_v1  ;;  %v244_v19 = vmul.f32 %v417_v11, %v397_v1  ;;  %v245_v22 = vmul.f32 %v420_v14, %v397_v1  ;;  %v246_v23 = vmul.f32 %v421_v15, %v397_v1  ;;  %p583_p8 = scmp.ne.s32.totalorder %s866_s30, %s582_s22  ;;  %s659_s4 = smov [#allocation8]  }
  0x71   : > { %v254_v20 = vadd.f32 %v398_v7, %v239_v12  ;;  %v255_v21 = vadd.f32 %v398_v7, %v240_v13  ;;  %v256_v24 = vadd.f32 %v398_v7, %v241_v16  ;;  %v257_v25 = vadd.f32 %v398_v7, %v242_v17  ;;  %s586_s27 = sshll.u32 %s659_s4, 4  ;;  %s587_s27 = int_to_ptr.vmem [resolvable:$false] %s586_s27 }
  0x72   : > { %v258_v26 = vadd.f32 %v398_v7, %v243_v18  ;;  %v259_v27 = vadd.f32 %v398_v7, %v244_v19  ;;  %v260_v30 = vadd.f32 %v398_v7, %v245_v22  ;;  %v261_v31 = vadd.f32 %v398_v7, %v246_v23  ;;  %p584_p5 = pnand %p583_p8, %p937_p4  ;;  %s588_s6 = scalar_lea.vmem %s587_s27, 2048 }
  0x73   : > { %v262_v28 = vmax.f32 %v254_v20, 0.0  ;;  %v263_v29 = vmax.f32 %v255_v21, 0.0  ;;  %v264_v32 = vmax.f32 %v256_v24, 0.0  ;;  %v265_v33 = vmax.f32 %v257_v25, 0.0  ;;  %p589_p2 = scmp.lt.s32.totalorder %s866_s30, %s587_s27  ;;  %p590_p0 = scmp.lt.s32.totalorder %s588_s6, %s582_s22 }
  0x74   : > { %v266_v34 = vmax.f32 %v258_v26, 0.0  ;;  %v267_v35 = vmax.f32 %v259_v27, 0.0  ;;  %v268_v36 = vmax.f32 %v260_v30, 0.0  ;;  %v269_v37 = vmax.f32 %v261_v31, 0.0  ;;  %p585_p10 = pneg %p584_p5 }
  0x75   : > { %270 = vst [vmem:[%s213_s23] sm:$0xff] %v262_v28  ;;  %271 = vst [vmem:[%s213_s23 + $0x8] sm:$0xff] %v263_v29  ;;  %p591_p9 = por %p590_p0, %p589_p2 }
  0x76   : > { %272 = vst [vmem:[%s213_s23 + $0x10] sm:$0xff] %v264_v32  ;;  %273 = vst [vmem:[%s213_s23 + $0x18] sm:$0xff] %v265_v33 }
  0x77   : > { %274 = vst [vmem:[%s213_s23 + $0x20] sm:$0xff] %v266_v34  ;;  %275 = vst [vmem:[%s213_s23 + $0x28] sm:$0xff] %v267_v35  ;;  %p592_p6 = pnand %p591_p9, %p585_p10 }
  0x78   : > { %276 = vst [vmem:[%s213_s23 + $0x30] sm:$0xff] %v268_v36  ;;  %277 = vst [vmem:[%s213_s23 + $0x38] sm:$0xff] %v269_v37 }
  0x79   : > { %595 = shalt.err (!%p592_p6)
}
  0x7a   : > { %s596_s7 = scalar_lea.hbm %s871_s11, 1024  ;;  %s600_s5 = scalar_lea.hbm %s918_s3, 2048 }
  0x7b   : > { %p597_p12 = scmp.ne.s32.totalorder %s871_s11, %s596_s7  ;;  %p601_p11 = scmp.lt.u32.totalorder %s871_s11, %s918_s3 }
  0x7c   : > { %p602_p3 = scmp.lt.u32.totalorder %s600_s5, %s596_s7  ;;  %p604_p8 = scmp.lt.u32.totalorder %s596_s7, %s871_s11 }
  0x7d   : > { %p598_p13 = pnand %p597_p12, %p937_p4 }
  0x7e   : > { %p603_p7 = por %p602_p3, %p601_p11 }
  0x7f   : > { %p599_p1 = pneg %p598_p13 }
  0x80   : > { %p605_p5 = por %p604_p8, %p603_p7 }
  0x82   : > { %p606_p10 = pnand %p605_p5, %p599_p1 }
  0x84   : > { %609 = shalt.err (!%p606_p10)
}
  0x85   : > { %s660_s26 = smov 128   ;;  %s661_s23 = smov 8  }
  0x86   : > { %435 = dma.vmem_to_hbm [thread:$0]  (%p937_p4), %s866_s30, 1024, %s871_s11, %s279_s20, %s660_s26, %s660_s26, %s661_s23  }
  0x87 PF: > { %s307_s9 = sand.u32 1, %s640_s12   ;;  %p938_p2 = scmp.ne.s32.totalorder %s927_s25, 0 }
  0x88   : > { %p939_p0 = scmp.ge.s32.totalorder %s652_s15, 2  ;;  %s308_s10 = scalar_lea.sflag [#allocation4], %s307_s9 }
  0x8a   : > { %p449_p9 = pnand %p939_p0, %p938_p2 }
  0x8c   : > { %635 = dma.done.wait (!%p449_p9), %s308_s10, 1024  }
  0x8d   : > { %637 = vsyncadd (!%p449_p9), %s308_s10, 4294966272  ;;  %p17_p6 = scmp.ge.s32.totalorder %s707_s18, 4   ;;  %s940_s12 = smov %s644_s13 }
  0x8e   : > { %s941_s13 = smov %s648_s14  ;;  %s942_s14 = smov %s719_s21 }
  0x8f   : > { %s943_s15 = smov %s707_s18  ;;  %19 = sbr.rel (!%p17_p6) target bundleno = 6 (0x6), region = 85 }
  0x96   :  { %313 = vsyncpa [#allocation3], 1 }
  0x97   :  { %315 = vsyncpa [#allocation3 + $0x1], 1 }
  0x98   :  { %316 = vsyncpa [#allocation6], 1 }
  0x99   :  { %317 = vsyncpa [#allocation4], 1 }
  0x9a   :  { %319 = vsyncpa [#allocation4 + $0x1], 1 }

// kernel: basic_deconvolution_block.2
= control target key start
LH: loop header
LB: loop body
LE: loop exit
PB: predicated region body
PF: predicated region fallthrough
CT: control target
= control target key end

     0   :  { %10 = vsyncpa [#allocation3], 0  ;;  %s1776_s0 = inlined_call_operand.hbm [shape: bf16[128,432], index: 0, kind: input, shape index: {}]   ;;  %s1777_s1 = inlined_call_operand.hbm [shape: bf16[432,128], index: 1, kind: input, shape index: {}]   ;;  %s1778_s2 = inlined_call_operand.hbm [shape: bf16[128,128], index: 2, kind: output, shape index: {0}]   ;;  %s1779_s3 = inlined_call_operand.hbm [shape: f32[2,1,128], index: 3, kind: output, shape index: {1}]   ;;  %s1780_s4 = inlined_call_operand.hbm [shape: f32[2,1,128], index: 4, kind: output, shape index: {2}]  }
   0x1   :  { %12 = vsyncpa [#allocation3 + $0x1], 0 }
   0x2   :  { %13 = vsyncpa [#allocation6], 0 }
   0x3   :  { %14 = vsyncpa [#allocation4], 0 }
   0x4   :  { %16 = vsyncpa [#allocation4 + $0x1], 0 }
   0x5   :  { %17 = vsyncpa [#allocation9], 0 }
   0x6   :  { %19 = vsyncpa [#allocation9 + $0x1], 0  ;;  %s1462_s15 = smov 0   ;;  %s1464_s16 = smov 0  }
   0x7   :  { %s1466_s17 = smov 0   ;;  %s1468_s18 = smov 0  }
   0x8 LB: > { %s1483_s19 = sadd.s32 4294967295, %s1423_s18   ;;  %s962_s20 = sadd.s32 4294967294, %s1423_s18   ;;  %s1423_s18 = sphi %s1468_s18, %s1800_s18   ;;  %s1419_s17 = sphi %s1466_s17, %s1799_s17   ;;  %s1415_s16 = sphi %s1464_s16, %s1798_s16   ;;  %s1411_s15 = sphi %s1462_s15, %s1797_s15  }
   0x9   : > { %p45_p0 = scmp.ne.s32.totalorder %s1415_s16, %s1411_s15  ;;  %p1781_p1 = scmp.eq.s32.totalorder %s1483_s19, 0 }
   0xa   : > { %p96_p3 = scmp.eq.s32.totalorder %s962_s20, 1  ;;  %p963_p5 = scmp.ge.s32.totalorder %s1423_s18, 1 }
   0xb   : > { %p1494_p4 = por %p1781_p1, %p45_p0  ;;  %p155_p7 = scmp.lt.s32.totalorder %s1423_s18, 3 }
   0xc   : > { %p1499_p6 = por %p96_p3, %p45_p0  ;;  %s1425_s24 = smov [#allocation5]  }
   0xd   : > { %s1784_s21 = scalar_select %p1494_p4, 1, 0 }
   0xe   : > { %s1785_s22 = scalar_select %p1499_p6, 1, 0 }
   0xf   : > { %p1504_p8 = pnand %p963_p5, %p155_p7  ;;  %s167_s25 = sshll.u32 %s1425_s24, 4  ;;  %s1508_s25 = int_to_ptr.vmem [resolvable:$true] %s167_s25 }
  0x10   : > { %s1520_s27 = sadd.s32 1, %s1423_s18   ;;  %s32_s28 = sadd.s32 1, %s1419_s17 }
  0x11   : > { %s1786_s23 = scalar_select %p1504_p8, 1, 0 }
  0x12   : > { %p1122_p9 = pneg %p1504_p8  ;;  %s29_s29 = ssub.s32 %s1423_s18, %s1520_s27 }
  0x13   : > { %s1235_s6 = scalar_lea.hbm %s1777_s1, 3456 }
  0x14   : > { %p1515_p11 = pnand %p1122_p9, %p1781_p1  ;;  %p1236_p12 = scmp.ne.s32.totalorder %s1777_s1, %s1235_s6 }
  0x15   : > { %p1242_p5 = scmp.lt.u32.totalorder %s1235_s6, %s1777_s1 }
  0x16   : > { %p1237_p13 = pneg %p1515_p11 }
  0x18   : > { %p1238_p0 = pnand %p1237_p13, %p1236_p12 }
  0x1a   : > { %p1239_p3 = pneg %p1238_p0 }
  0x1c   : > { %p1244_p7 = pnand %p1242_p5, %p1239_p3 }
  0x1e   : > { %1247 = shalt.err (!%p1244_p7)
}
  0x1f   : > { %s1248_s11 = scalar_lea.vmem %s1508_s25, 3456  ;;  %p1256_p2 = scmp.lt.s32.totalorder %s1508_s25, %s1508_s25 }
  0x20   : > { %p1249_p9 = scmp.ne.s32.totalorder %s1508_s25, %s1248_s11  ;;  %p1257_p6 = scmp.lt.s32.totalorder %s1248_s11, %s1248_s11 }
  0x22   : > { %p1251_p10 = pnand %p1249_p9, %p1237_p13  ;;  %p1258_p4 = por %p1257_p6, %p1256_p2 }
  0x24   : > { %p1252_p1 = pneg %p1251_p10 }
  0x26   : > { %p1259_p8 = pnand %p1258_p4, %p1252_p1 }
  0x28   : > { %1262 = shalt.err (!%p1259_p8)
}
  0x29   : > { %s1426_s12 = smov 64   ;;  %s1427_s13 = smov 4  }
  0x2a   : > { %1125 = dma.hbm_to_vmem [thread:$0]  (!%p1515_p11), %s1777_s1, 3456, %s1508_s25, [#allocation6], %s1426_s12, %s1426_s12, %s1427_s13  }
  0x2b   : > { %p30_p2 = scmp.eq.s32.totalorder %s29_s29, 0  ;;  %p39_p1 = scmp.ne.s32.totalorder %s1419_s17, %s1415_s16 }
  0x2c   : > { %p40_p4 = scmp.eq.s32.totalorder %s1423_s18, 0  ;;  %p1141_p6 = scmp.lt.s32.totalorder %s1423_s18, 2 }
  0x2d   : > { %s1551_s30 = scalar_select %p30_p2, %s1419_s17, %s32_s28  }
  0x2e   : > { %p41_p8 = por %p40_p4, %p39_p1  ;;  %p1788_p10 = scmp.eq.s32.totalorder %s1483_s19, 1 }
  0x2f   : > { %s181_s6 = sand.u32 1, %s1419_s17   ;;  %s1037_s7 = sshll.u32 %s1423_s18, 11 }
  0x30   : > { %p1555_p12 = por %p1788_p10, %p39_p1  ;;  %s966_s8 = sshll.u32 %s181_s6, 7 }
  0x31   : > { %s1564_s10 = scalar_lea.hbm %s1776_s0, %s1037_s7  ;;  %s185_s25 = scalar_lea.vmem [#allocation2], %s966_s8 }
  0x32   : > { %s193_s28 = sshll.u32 %s185_s25, 4  ;;  %p1566_p11 = pnand %p1141_p6, %p41_p8  ;;  %s1570_s28 = int_to_ptr.vmem [resolvable:$true] %s193_s28 }
  0x33   : > { %s1572_s11 = scalar_lea.sflag [#allocation3], %s181_s6  ;;  %s1263_s12 = scalar_lea.hbm %s1564_s10, 2048 }
  0x34   : > { %p1264_p13 = scmp.ne.s32.totalorder %s1564_s10, %s1263_s12  ;;  %p1265_p0 = pneg %p1566_p11 }
  0x35   : > { %s1268_s24 = scalar_lea.hbm %s1776_s0, 4096  ;;  %p1269_p7 = scmp.lt.u32.totalorder %s1564_s10, %s1776_s0 }
  0x36   : > { %p1266_p3 = pnand %p1265_p0, %p1264_p13  ;;  %p1270_p9 = scmp.lt.u32.totalorder %s1268_s24, %s1263_s12 }
  0x37   : > { %p1272_p1 = scmp.lt.u32.totalorder %s1263_s12, %s1564_s10 }
  0x38   : > { %p1267_p5 = pneg %p1266_p3  ;;  %p1271_p2 = por %p1270_p9, %p1269_p7 }
  0x3a   : > { %p1273_p4 = por %p1272_p1, %p1271_p2 }
  0x3c   : > { %p1274_p6 = pnand %p1273_p4, %p1267_p5 }
  0x3e   : > { %1277 = shalt.err (!%p1274_p6)
}
  0x3f   : > { %s1278_s6 = scalar_lea.vmem %s1570_s28, 2048  ;;  %s1428_s26 = smov [#allocation2]  }
  0x40   : > { %p1279_p8 = scmp.ne.s32.totalorder %s1570_s28, %s1278_s6  ;;  %s1283_s9 = sshll.u32 %s1428_s26, 4  ;;  %s1284_s9 = int_to_ptr.vmem [resolvable:$false] %s1283_s9 }
  0x41   : > { %s1285_s25 = scalar_lea.vmem %s1284_s9, 4096  ;;  %p1286_p3 = scmp.lt.s32.totalorder %s1570_s28, %s1284_s9 }
  0x42   : > { %p1281_p10 = pnand %p1279_p8, %p1265_p0  ;;  %p1287_p7 = scmp.lt.s32.totalorder %s1285_s25, %s1278_s6 }
  0x44   : > { %p1282_p13 = pneg %p1281_p10  ;;  %p1288_p9 = por %p1287_p7, %p1286_p3 }
  0x46   : > { %p1289_p2 = pnand %p1288_p9, %p1282_p13 }
  0x48   : > { %1292 = shalt.err (!%p1289_p2)
}
  0x49   : > { %s1429_s12 = smov 256   ;;  %s1430_s13 = smov 16  }
  0x4a   : > { %1129 = dma.hbm_to_vmem [thread:$0]  (!%p1566_p11), %s1564_s10, 2048, %s1570_s28, %s1572_s11, %s1429_s12, %s1429_s12, %s1430_s13  }
  0x4b   : > { %p1791_p0 = scmp.ne.s32.totalorder %s1786_s23, 0 }
  0x4c   : > { %s1603_s14 = sand.u32 (!%p1791_p0), 1, %s1415_s16   ;;  %p1792_p5 = scmp.ne.s32.totalorder (!%p1791_p0), %s1784_s21, 0 }
  0x4d   : > { %205 = sbr.rel (%p1791_p0) target bundleno = 439 (0x1b7), region = 28  ;;  %s971_s24 = sshll.u32 (!%p1791_p0), %s1603_s14, 7 }
  0x4e   : > { %s208_s7 = scalar_lea.sflag (!%p1791_p0), [#allocation3], %s1603_s14  ;;  %s1607_s8 = scalar_lea.vmem (!%p1791_p0), [#allocation2], %s971_s24 }
  0x54   : > { %1394 = dma.done.wait (%p1792_p5), %s208_s7, 2048  }
  0x55   : > { %1396 = vsyncadd (%p1792_p5), %s208_s7, 4294965248  ;;  %p1793_p11 = scmp.eq.s32.totalorder %s1483_s19, 0 }
  0x57   : > { %1398 = dma.done.wait (%p1793_p11), [#allocation6], 3456   ;;  %p1794_p1 = pmov %p1793_p11 }
  0x58   : > { %v1431_v0 = vmov 0   ;;  %v1184_v1 = vld [vmem:[#allocation5 + $0x80] sm:$0xff]   ;;  %v1185_v2 = vld [vmem:[#allocation5 + $0x88] sm:$0xff]   ;;  %v1188_v5 = vld [vmem:[#allocation5 + $0x90] sm:$0xff]   ;;  %vm559_vm0 = vcmask 392192   ;;  %s973_s21 = sshll.u32 %s1603_s14, 5 }
  0x59   : > { %1400 = vsyncadd (%p1794_p1), [#allocation6], 4294963840  ;;  %637 = vmatprep.subr.bf16.mxu1 %v1431_v0  ;;  %v1186_v3 = vld [vmem:[#allocation5 + $0x40] sm:$0xff]   ;;  %v1189_v6 = vld [vmem:[#allocation5 + $0x48] sm:$0xff]   ;;  %s1649_s23 = scalar_lea.vmem [#allocation7], %s973_s21  ;;  %s1046_s28 = sshll.u32 %s1483_s19, 9 }
  0x5a   : > { %638 = vmatpush1.bf16.msra.mxu1 %v1184_v1  ;;  %v1187_v4 = vld [vmem:[#allocation5] sm:$0xff]   ;;  %1070 = vmatprep.subr.bf16.mxu0 %v1186_v3  ;;  %v1190_v7 = vld [vmem:[#allocation5 + $0x8] sm:$0xff]   ;;  %v1192_v8 = vld [vmem:[#allocation5 + $0x50] sm:$0xff]   ;;  %s800_s10 = sshll.u32 %s1649_s23, 4  ;;  %s1661_s6 = scalar_lea.hbm %s1778_s2, %s1046_s28  ;;  %s1656_s10 = int_to_ptr.vmem [resolvable:$true] %s800_s10 }
  0x5b   : > { %639 = vmatprep.subr.bf16.mxu1 %v1431_v0  ;;  %1071 = vmatpush3.bf16.msra.mxu0 %v1187_v4  ;;  %v1193_v9 = vld [vmem:[#allocation5 + $0x10] sm:$0xff]   ;;  %v1191_v10 = vld [vmem:[#allocation5 + $0x98] sm:$0xff]   ;;  %v1194_v12 = vld [vmem:[#allocation5 + $0xa0] sm:$0xff]   ;;  %s779_s26 = scalar_lea.sflag [#allocation4], %s1603_s14  ;;  %s1293_s9 = scalar_lea.vmem %s1656_s10, 512 }
  0x5c   : > { %1072 = vmatprep.subr.bf16.mxu0 %v1189_v6  ;;  %v1195_v11 = vld [vmem:[#allocation5 + $0x58] sm:$0xff]   ;;  %v1198_v14 = vld [vmem:[#allocation5 + $0x60] sm:$0xff]   ;;  %v1197_v15 = vld [vmem:[#allocation5 + $0xa8] sm:$0xff]   ;;  %p1294_p4 = scmp.ne.s32.totalorder %s1656_s10, %s1293_s9  ;;  %s1432_s25 = smov [#allocation7]  }
  0x5d   : > { %v1196_v13 = vld [vmem:[#allocation5 + $0x18] sm:$0xff]   ;;  %v1199_v16 = vld [vmem:[#allocation5 + $0x20] sm:$0xff]   ;;  %v1201_v17 = vld [vmem:[#allocation5 + $0x68] sm:$0xff]   ;;  %s1297_s12 = sshll.u32 %s1432_s25, 4  ;;  %s1298_s12 = int_to_ptr.vmem [resolvable:$false] %s1297_s12 }
  0x5e   : > { %640 = vmatpush1.bf16.msra.mxu1 %v1185_v2  ;;  %v1200_v18 = vld [vmem:[#allocation5 + $0xb0] sm:$0xff]   ;;  %v1202_v19 = vld [vmem:[#allocation5 + $0x28] sm:$0xff]   ;;  %v1203_v21 = vld [vmem:[#allocation5 + $0xb8] sm:$0xff]   ;;  %p1295_p6 = pnand %p1294_p4, %p1555_p12  ;;  %s1299_s13 = scalar_lea.vmem %s1298_s12, 1024 }
  0x5f   : > { %641 = vmatprep.subr.bf16.mxu1 %v1431_v0  ;;  %1073 = vmatpush3.bf16.msra.mxu0 %v1190_v7  ;;  %v1204_v20 = vld [vmem:[#allocation5 + $0x70] sm:$0xff]   ;;  %v1207_v23 = vld [vmem:[#allocation5 + $0x78] sm:$0xff]   ;;  %v1206_v27 = vld [vmem:[#allocation5 + $0xc0] sm:$0xff]   ;;  %p1300_p10 = scmp.lt.s32.totalorder %s1656_s10, %s1298_s12  ;;  %p1301_p13 = scmp.lt.s32.totalorder %s1299_s13, %s1293_s9 }
  0x60   : > { %1074 = vmatprep.subr.bf16.mxu0 %v1192_v8  ;;  %v1205_v22 = vld [vmem:[#allocation5 + $0x30] sm:$0xff]   ;;  %v1208_v25 = vld [vmem:[#allocation5 + $0x38] sm:$0xff]   ;;  %v1212_v30 = vld [vmem:[#allocation5 + $0xc8] sm:$0xff]   ;;  %p1296_p8 = pneg %p1295_p6 }
  0x61   : > { %v1211_v24 = vld [vmem:[%s1607_s8 + $0x4] ss:$16 sps:$4 sm:$0xff]   ;;  %v1216_v26 = vld [vmem:[%s1607_s8 + $0xc] ss:$16 sps:$4 sm:$0xff]   ;;  %v1209_v28 = vld [vmem:[%s1607_s8] ss:$16 sps:$4 sm:$0xff]   ;;  %p1302_p3 = por %p1301_p13, %p1300_p10 }
  0x62   : > { %642 = vmatpush1.bf16.msra.mxu1 %v1188_v5  ;;  %604 = vmatprep.mubr.bf16.mxu0 %v1211_v24  ;;  %v1217_v29 = vld [vmem:[%s1607_s8 + $0x24] ss:$16 sps:$4 sm:$0xff]   ;;  %v1219_v32 = vld [vmem:[%s1607_s8 + $0x20] ss:$16 sps:$4 sm:$0xff]   ;;  %v1214_v33 = vld [vmem:[%s1607_s8 + $0x8] ss:$16 sps:$4 sm:$0xff]  }
  0x63   : > { %643 = vmatprep.subr.bf16.mxu1 %v1431_v0  ;;  %1075 = vmatpush3.bf16.msra.mxu0 %v1193_v9  ;;  %v1213_v31 = vld [vmem:[#allocation5 + $0xd0] sm:$0xff]   ;;  %v1220_v35 = vld [vmem:[%s1607_s8 + $0x2c] ss:$16 sps:$4 sm:$0xff]   ;;  %v1222_v37 = vld [vmem:[%s1607_s8 + $0x28] ss:$16 sps:$4 sm:$0xff]   ;;  %p1303_p7 = pnand %p1302_p3, %p1296_p8 }
  0x64   : > { %1076 = vmatprep.subr.bf16.mxu0 %v1195_v11  ;;  %1017 = vmatprep.mubr.msk.bf16.mxu1 %vm559_vm0, %v1216_v26  ;;  %v1223_v34 = vld [vmem:[%s1607_s8 + $0x44] ss:$16 sps:$4 sm:$0xff]   ;;  %v1225_v36 = vld [vmem:[%s1607_s8 + $0x40] ss:$16 sps:$4 sm:$0xff]   ;;  %v1226_v39 = vld [vmem:[%s1607_s8 + $0x4c] ss:$16 sps:$4 sm:$0xff]  }
  0x65   : > { %v1229_v38 = vld [vmem:[%s1607_s8 + $0x64] ss:$16 sps:$4 sm:$0xff]   ;;  %v1231_v40 = vld [vmem:[%s1607_s8 + $0x60] ss:$16 sps:$4 sm:$0xff]   ;;  %v1228_v41 = vld [vmem:[%s1607_s8 + $0x48] ss:$16 sps:$4 sm:$0xff]  }
  0x66   : > { %644 = vmatpush1.bf16.msra.mxu1 %v1191_v10  ;;  %v1232_v42 = vld [vmem:[%s1607_s8 + $0x6c] ss:$16 sps:$4 sm:$0xff]   ;;  %v1234_v43 = vld [vmem:[%s1607_s8 + $0x68] ss:$16 sps:$4 sm:$0xff]  }
  0x67   : > { %645 = vmatprep.subr.bf16.mxu1 %v1431_v0  ;;  %1077 = vmatpush3.bf16.msra.mxu0 %v1196_v13 }
  0x68   : > { %1078 = vmatprep.subr.bf16.mxu0 %v1198_v14 }
  0x6a   : > { %646 = vmatpush1.bf16.msra.mxu1 %v1194_v12 }
  0x6b   : > { %647 = vmatprep.subr.bf16.mxu1 %v1431_v0  ;;  %1079 = vmatpush3.bf16.msra.mxu0 %v1199_v16 }
  0x6c   : > { %1080 = vmatprep.subr.bf16.mxu0 %v1201_v17 }
  0x6e   : > { %648 = vmatpush1.bf16.msra.mxu1 %v1197_v15 }
  0x6f   : > { %649 = vmatprep.subr.bf16.mxu1 %v1431_v0  ;;  %1081 = vmatpush3.bf16.msra.mxu0 %v1202_v19 }
  0x70   : > { %1082 = vmatprep.subr.bf16.mxu0 %v1204_v20 }
  0x72   : > { %650 = vmatpush1.bf16.msra.mxu1 %v1200_v18 }
  0x73   : > { %651 = vmatprep.subr.bf16.mxu1 %v1431_v0  ;;  %1083 = vmatpush3.bf16.msra.mxu0 %v1205_v22 }
  0x74   : > { %1084 = vmatprep.subr.bf16.mxu0 %v1207_v23 }
  0x76   : > { %652 = vmatpush1.bf16.msra.mxu1 %v1203_v21 }
  0x77   : > { %653 = vmatprep.subr.bf16.mxu1 %v1431_v0  ;;  %1085 = vmatpush3.bf16.msra.mxu0 %v1208_v25 }
  0x7a   : > { %654 = vmatpush1.bf16.msra.mxu1 %v1206_v27  ;;  %605 = vmatmul.mubr.bf16.vlgmr.msra.gmra.mrb[0].mxu0 %v1209_v28 }
  0x7b   : > { %655 = vmatprep.subr.bf16.mxu1 %v1431_v0  ;;  %612 = vmatprep.mubr.bf16.mxu0 %v1217_v29 }
  0x7e   : > { %656 = vmatpush1.bf16.msra.mxu1 %v1212_v30 }
  0x7f   : > { %657 = vmatprep.subr.bf16.mxu1 %v1431_v0 }
  0x82   : > { %658 = vmatpush1.bf16.msra.mxu1 %v1213_v31  ;;  %613 = vmatmul.mubr.bf16.gmra.mrb[4].mxu0 %v1219_v32 }
  0x83   : > { %620 = vmatprep.mubr.bf16.mxu0 %v1223_v34 }
  0x85   : > { %670 = vmatmul.mubr.bf16.vlgmr.msra.gmra.mrb[0].mxu1 %v1214_v33 }
  0x86   : > { %1018 = vmatprep.mubr.msk.bf16.mxu1 %vm559_vm0, %v1220_v35 }
  0x8a   : > { %621 = vmatmul.mubr.bf16.gmra.mrb[8].mxu0 %v1225_v36 }
  0x8b   : > { %628 = vmatprep.mubr.bf16.mxu0 %v1229_v38 }
  0x8d   : > { %678 = vmatmul.mubr.bf16.gmra.mrb[4].mxu1 %v1222_v37 }
  0x8e   : > { %1019 = vmatprep.mubr.msk.bf16.mxu1 %vm559_vm0, %v1226_v39 }
  0x92   : > { %629 = vmatmul.mubr.bf16.gmra.mrb[12].mxu0 %v1231_v40 }
  0x95   : > { %686 = vmatmul.mubr.bf16.gmra.mrb[8].mxu1 %v1228_v41 }
  0x96   : > { %1020 = vmatprep.mubr.msk.bf16.mxu1 %vm559_vm0, %v1232_v42 }
  0x9d   : > { %694 = vmatmul.mubr.bf16.gmra.mrb[12].mxu1 %v1234_v43 }
 0x14d   : > { %v1086_v44 = vpop.f32.mrb[0].mxu0 }
 0x14e   : > { %v1087_v45 = vpop.f32.mrb[1].mxu0 }
 0x14f   : > { %v1088_v46 = vadd.f32 %v1087_v45, %v1086_v44  ;;  %v1089_v47 = vpop.f32.mrb[2].mxu0 }
 0x150   : > { %v1090_v48 = vpop.f32.mrb[3].mxu0 }
 0x151   : > { %v1091_v49 = vadd.f32 %v1090_v48, %v1089_v47 }
 0x155   : > { %v1092_v50 = vpop.f32.mrb[4].mxu0 }
 0x156   : > { %v1093_v52 = vpop.f32.mrb[5].mxu0 }
 0x157   : > { %v1094_v55 = vadd.f32 %v1093_v52, %v1092_v50  ;;  %v1095_v56 = vpop.f32.mrb[6].mxu0 }
 0x158   : > { %v671_v51 = vpop.f32.mrb[0].mxu1  ;;  %v1096_v58 = vpop.f32.mrb[7].mxu0 }
 0x159   : > { %v672_v53 = vadd.f32 %v1088_v46, %v671_v51  ;;  %v673_v54 = vpop.f32.mrb[1].mxu1  ;;  %v1097_v61 = vadd.f32 %v1096_v58, %v1095_v56 }
 0x15a   : > { %v674_v57 = vpop.f32.mrb[2].mxu1 }
 0x15b   : > { %v675_v59 = vadd.f32 %v1091_v49, %v674_v57  ;;  %v676_v60 = vpop.f32.mrb[3].mxu1  ;;  %v756_v62 = vmul.f32 %v672_v53, %v672_v53 }
 0x15d   : > { %v1050_v63 = vpack.c.bf16 %v675_v59, %v672_v53  ;;  %v742_v0 = vadd.f32 %v675_v59, %v672_v53  ;;  %v757_v1 = vmul.f32 %v675_v59, %v675_v59  ;;  %v1098_v3 = vpop.f32.mrb[8].mxu0 }
 0x15e   : > { %v1099_v5 = vpop.f32.mrb[9].mxu0 }
 0x15f   : > { %1051 = vst [vmem:[%s1649_s23] sm:$0xff] %v1050_v63   ;;  %v764_v2 = vadd.f32 %v757_v1, %v756_v62  ;;  %v1100_v8 = vadd.f32 %v1099_v5, %v1098_v3  ;;  %v1101_v9 = vpop.f32.mrb[10].mxu0 }
 0x160   : > { %v679_v4 = vpop.f32.mrb[4].mxu1  ;;  %v1102_v11 = vpop.f32.mrb[11].mxu0 }
 0x161   : > { %v680_v6 = vadd.f32 %v1094_v55, %v679_v4  ;;  %v681_v7 = vpop.f32.mrb[5].mxu1  ;;  %v1103_v16 = vadd.f32 %v1102_v11, %v1101_v9 }
 0x162   : > { %v682_v10 = vpop.f32.mrb[6].mxu1 }
 0x163   : > { %v743_v12 = vadd.f32 %v742_v0, %v680_v6  ;;  %v758_v13 = vmul.f32 %v680_v6, %v680_v6  ;;  %v683_v14 = vadd.f32 %v1097_v61, %v682_v10  ;;  %v684_v15 = vpop.f32.mrb[7].mxu1 }
 0x165   : > { %v765_v17 = vadd.f32 %v764_v2, %v758_v13  ;;  %v1055_v18 = vpack.c.bf16 %v683_v14, %v680_v6  ;;  %v744_v19 = vadd.f32 %v743_v12, %v683_v14  ;;  %v759_v20 = vmul.f32 %v683_v14, %v683_v14  ;;  %v1104_v22 = vpop.f32.mrb[12].mxu0 }
 0x166   : > { %v1105_v24 = vpop.f32.mrb[13].mxu0 }
 0x167   : > { %1067 = vst [vmem:[%s1649_s23 + $0x8] sm:$0xff] %v1055_v18   ;;  %v766_v21 = vadd.f32 %v765_v17, %v759_v20  ;;  %v1106_v27 = vadd.f32 %v1105_v24, %v1104_v22  ;;  %v1107_v28 = vpop.f32.mrb[14].mxu0 }
 0x168   : > { %v687_v23 = vpop.f32.mrb[8].mxu1  ;;  %v1108_v30 = vpop.f32.mrb[15].mxu0 }
 0x169   : > { %v688_v25 = vadd.f32 %v1100_v8, %v687_v23  ;;  %v689_v26 = vpop.f32.mrb[9].mxu1  ;;  %v1109_v35 = vadd.f32 %v1108_v30, %v1107_v28 }
 0x16a   : > { %v690_v29 = vpop.f32.mrb[10].mxu1 }
 0x16b   : > { %v745_v31 = vadd.f32 %v744_v19, %v688_v25  ;;  %v760_v32 = vmul.f32 %v688_v25, %v688_v25  ;;  %v691_v33 = vadd.f32 %v1103_v16, %v690_v29  ;;  %v692_v34 = vpop.f32.mrb[11].mxu1 }
 0x16d   : > { %v767_v36 = vadd.f32 %v766_v21, %v760_v32  ;;  %v1060_v37 = vpack.c.bf16 %v691_v33, %v688_v25  ;;  %v746_v38 = vadd.f32 %v745_v31, %v691_v33  ;;  %v761_v39 = vmul.f32 %v691_v33, %v691_v33 }
 0x16f   : > { %1068 = vst [vmem:[%s1649_s23 + $0x10] sm:$0xff] %v1060_v37   ;;  %v768_v40 = vadd.f32 %v767_v36, %v761_v39 }
 0x170   : > { %v695_v41 = vpop.f32.mrb[12].mxu1 }
 0x171   : > { %v696_v42 = vadd.f32 %v1106_v27, %v695_v41  ;;  %v697_v43 = vpop.f32.mrb[13].mxu1 }
 0x172   : > { %v698_v44 = vpop.f32.mrb[14].mxu1 }
 0x173   : > { %v747_v45 = vadd.f32 %v746_v38, %v696_v42  ;;  %v762_v46 = vmul.f32 %v696_v42, %v696_v42  ;;  %v699_v47 = vadd.f32 %v1109_v35, %v698_v44  ;;  %v700_v48 = vpop.f32.mrb[15].mxu1 }
 0x175   : > { %v769_v49 = vadd.f32 %v768_v40, %v762_v46  ;;  %v1065_v50 = vpack.c.bf16 %v699_v47, %v696_v42  ;;  %v748_v51 = vadd.f32 %v747_v45, %v699_v47  ;;  %v763_v52 = vmul.f32 %v699_v47, %v699_v47 }
 0x177   : > { %1069 = vst [vmem:[%s1649_s23 + $0x18] sm:$0xff] %v1065_v50   ;;  %v749_v53 = vrot.slane %v748_v51, 4  ;;  %v770_v54 = vadd.f32 %v769_v49, %v763_v52 }
 0x178   : > { %1306 = shalt.err (!%p1303_p7)
}
 0x179   : > { %s1307_s24 = scalar_lea.hbm %s1661_s6, 512  ;;  %s1311_s21 = scalar_lea.hbm %s1778_s2, 1024 }
 0x17a   : > { %p1308_p9 = scmp.ne.s32.totalorder %s1661_s6, %s1307_s24  ;;  %p1312_p5 = scmp.lt.u32.totalorder %s1661_s6, %s1778_s2 }
 0x17b   : > { %p1313_p11 = scmp.lt.u32.totalorder %s1311_s21, %s1307_s24  ;;  %p1315_p4 = scmp.lt.u32.totalorder %s1307_s24, %s1661_s6 }
 0x17c   : > { %p1309_p2 = pnand %p1308_p9, %p1555_p12 }
 0x17d   : > { %p1314_p1 = por %p1313_p11, %p1312_p5 }
 0x17e   : > { %p1310_p0 = pneg %p1309_p2 }
 0x17f   : > { %p1316_p6 = por %p1315_p4, %p1314_p1 }
 0x181   : > { %p1317_p8 = pnand %p1316_p6, %p1310_p0 }
 0x183   : > { %1320 = shalt.err (!%p1317_p8)
}
 0x184   : > { %s1433_s29 = smov 64   ;;  %s1434_s11 = smov 4   ;;  %v750_v55 = vadd.f32 %v749_v53, %v748_v51  ;;  %v771_v56 = vrot.slane %v770_v54, 4 }
 0x185   : > { %1116 = dma.vmem_to_hbm [thread:$0]  (%p1555_p12), %s1656_s10, 512, %s1661_s6, %s779_s26, %s1433_s29, %s1433_s29, %s1434_s11  }
 0x186   : > { %v751_v57 = vrot.slane %v750_v55, 2  ;;  %v772_v58 = vadd.f32 %v771_v56, %v770_v54  ;;  %s783_s9 = sand.u32 1, %s1483_s19   ;;  %s1032_s25 = sshll.u32 %s1483_s19, 4 }
 0x187   : > { %s241_s12 = scalar_lea.vmem [#allocation8], %s1603_s14  ;;  %s247_s24 = scalar_lea.vmem [#allocation10], %s1603_s14 }
 0x188   : > { %v752_v59 = vadd.f32 %v751_v57, %v750_v55  ;;  %v773_v60 = vrot.slane %v772_v58, 2  ;;  %s816_s13 = sshll.u32 %s241_s12, 4  ;;  %s829_s7 = sshll.u32 %s247_s24, 4  ;;  %s1699_s13 = int_to_ptr.vmem [resolvable:$true] %s816_s13  ;;  %s1706_s7 = int_to_ptr.vmem [resolvable:$true] %s829_s7 }
 0x189   : > { %s1697_s6 = scalar_lea.hbm %s1779_s3, %s1032_s25  ;;  %s1704_s21 = scalar_lea.hbm %s1780_s4, %s1032_s25 }
 0x18a   : > { %v753_v61 = vrot.slane %v752_v59, 1  ;;  %v774_v62 = vadd.f32 %v773_v60, %v772_v58  ;;  %s1708_s23 = scalar_lea.sflag [#allocation9], %s783_s9  ;;  %s1321_s28 = scalar_lea.vmem %s1699_s13, 16 }
 0x18b   : > { %p1322_p10 = scmp.ne.s32.totalorder %s1699_s13, %s1321_s28  ;;  %s1435_s29 = smov [#allocation8]  }
 0x18c   : > { %v775_v63 = vrot.slane %v774_v62, 1  ;;  %v754_v0 = vadd.f32 %v753_v61, %v752_v59  ;;  %s1325_s11 = sshll.u32 %s1435_s29, 4  ;;  %s1326_s11 = int_to_ptr.vmem [resolvable:$false] %s1325_s11 }
 0x18d   : > { %p1323_p13 = pnand %p1322_p10, %p1555_p12  ;;  %s1327_s8 = scalar_lea.vmem %s1326_s11, 32 }
 0x18e   : > { %755 = vst [vmem:[%s241_s12] sm:$0x1] %v754_v0  ;;  %v776_v1 = vadd.f32 %v775_v63, %v774_v62  ;;  %p1328_p7 = scmp.lt.s32.totalorder %s1699_s13, %s1326_s11  ;;  %p1329_p9 = scmp.lt.s32.totalorder %s1327_s8, %s1321_s28 }
 0x18f   : > { %p1324_p3 = pneg %p1323_p13 }
 0x190   : > { %p1330_p2 = por %p1329_p9, %p1328_p7 }
 0x192   : > { %p1331_p0 = pnand %p1330_p2, %p1324_p3 }
 0x194   : > { %1334 = shalt.err (!%p1331_p0)
}
 0x195   : > { %s1335_s9 = scalar_lea.hbm %s1697_s6, 16  ;;  %s1339_s10 = scalar_lea.hbm %s1779_s3, 32 }
 0x196   : > { %p1336_p5 = scmp.ne.s32.totalorder %s1697_s6, %s1335_s9  ;;  %p1340_p4 = scmp.lt.u32.totalorder %s1697_s6, %s1779_s3 }
 0x197   : > { %p1341_p6 = scmp.lt.u32.totalorder %s1339_s10, %s1335_s9  ;;  %p1343_p10 = scmp.lt.u32.totalorder %s1335_s9, %s1697_s6 }
 0x198   : > { %p1337_p11 = pnand %p1336_p5, %p1555_p12 }
 0x199   : > { %p1342_p8 = por %p1341_p6, %p1340_p4 }
 0x19a   : > { %p1338_p1 = pneg %p1337_p11 }
 0x19b   : > { %p1344_p13 = por %p1343_p10, %p1342_p8 }
 0x19d   : > { %p1345_p3 = pnand %p1344_p13, %p1338_p1 }
 0x19f   : > { %1348 = shalt.err (!%p1345_p3)
}
 0x1a0   : > { %1117 = dma.vmem_to_hbm [thread:$0]  (%p1555_p12), %s1699_s13, 16, %s1697_s6, %s1708_s23   ;;  %777 = vst [vmem:[%s247_s24] sm:$0x1] %v776_v1 }
 0x1a1   : > { %s1349_s28 = scalar_lea.vmem %s1706_s7, 16  ;;  %s1436_s29 = smov [#allocation10]  }
 0x1a2   : > { %p1350_p7 = scmp.ne.s32.totalorder %s1706_s7, %s1349_s28  ;;  %s1353_s11 = sshll.u32 %s1436_s29, 4  ;;  %s1354_s11 = int_to_ptr.vmem [resolvable:$false] %s1353_s11 }
 0x1a3   : > { %s1355_s8 = scalar_lea.vmem %s1354_s11, 32  ;;  %p1356_p0 = scmp.lt.s32.totalorder %s1706_s7, %s1354_s11 }
 0x1a4   : > { %p1351_p9 = pnand %p1350_p7, %p1555_p12  ;;  %p1357_p5 = scmp.lt.s32.totalorder %s1355_s8, %s1349_s28 }
 0x1a6   : > { %p1352_p2 = pneg %p1351_p9  ;;  %p1358_p11 = por %p1357_p5, %p1356_p0 }
 0x1a8   : > { %p1359_p1 = pnand %p1358_p11, %p1352_p2 }
 0x1aa   : > { %1362 = shalt.err (!%p1359_p1)
}
 0x1ab   : > { %s1363_s14 = scalar_lea.hbm %s1704_s21, 16  ;;  %s1367_s6 = scalar_lea.hbm %s1780_s4, 32 }
 0x1ac   : > { %p1364_p4 = scmp.ne.s32.totalorder %s1704_s21, %s1363_s14  ;;  %p1368_p10 = scmp.lt.u32.totalorder %s1704_s21, %s1780_s4 }
 0x1ad   : > { %p1369_p13 = scmp.lt.u32.totalorder %s1367_s6, %s1363_s14  ;;  %p1371_p7 = scmp.lt.u32.totalorder %s1363_s14, %s1704_s21 }
 0x1ae   : > { %p1365_p6 = pnand %p1364_p4, %p1555_p12 }
 0x1af   : > { %p1370_p3 = por %p1369_p13, %p1368_p10 }
 0x1b0   : > { %p1366_p8 = pneg %p1365_p6 }
 0x1b1   : > { %p1372_p9 = por %p1371_p7, %p1370_p3 }
 0x1b3   : > { %p1373_p2 = pnand %p1372_p9, %p1366_p8 }
 0x1b5   : > { %1376 = shalt.err (!%p1373_p2)
}
 0x1b6   : > { %1118 = dma.vmem_to_hbm [thread:$0]  (%p1555_p12), %s1706_s7, 16, %s1704_s21, %s1708_s23  }
 0x1b7 PF: > { %s841_s12 = sand.u32 1, %s1411_s15   ;;  %p1795_p0 = scmp.ne.s32.totalorder %s1785_s22, 0 }
 0x1b8   : > { %p1796_p5 = scmp.ge.s32.totalorder %s1423_s18, 2  ;;  %s842_s10 = scalar_lea.sflag [#allocation4], %s841_s12 }
 0x1ba   : > { %p1131_p11 = pnand %p1796_p5, %p1795_p0 }
 0x1bc   : > { %1402 = dma.done.wait (!%p1131_p11), %s842_s10, 512  }
 0x1bd   : > { %1404 = vsyncadd (!%p1131_p11), %s842_s10, 4294966784  ;;  %s850_s19 = sand.u32 1, %s962_s20  }
 0x1be   : > { %s851_s26 = scalar_lea.sflag [#allocation9], %s850_s19 }
 0x1bf   : > { %1406 = dma.done.wait (!%p1131_p11), %s851_s26, 32  }
 0x1c0   : > { %1408 = vsyncadd (!%p1131_p11), %s851_s26, 4294967264  ;;  %p22_p12 = scmp.ge.s32.totalorder %s1520_s27, 4   ;;  %s1797_s15 = smov %s1415_s16 }
 0x1c1   : > { %s1798_s16 = smov %s1419_s17  ;;  %s1799_s17 = smov %s1551_s30 }
 0x1c2   : > { %s1800_s18 = smov %s1520_s27  ;;  %24 = sbr.rel (!%p22_p12) target bundleno = 8 (0x8), region = 109 }
 0x1c9   :  { %863 = vsyncpa [#allocation3], 1 }
 0x1ca   :  { %865 = vsyncpa [#allocation3 + $0x1], 1 }
 0x1cb   :  { %866 = vsyncpa [#allocation6], 1 }
 0x1cc   :  { %867 = vsyncpa [#allocation4], 1 }
 0x1cd   :  { %869 = vsyncpa [#allocation4 + $0x1], 1 }
 0x1ce   :  { %870 = vsyncpa [#allocation9], 1 }
 0x1cf   :  { %872 = vsyncpa [#allocation9 + $0x1], 1 }

</bundles_post_ra>
